<compile_context>
chip_gen: v6e
topology: v6e:2x2x1
jax: 0.10.0
libtpu: 0.0.40
codegen_flags: <defaults>
</compile_context>

<pallas_src>
import jax
import jax.numpy as jnp
from jax.experimental import pallas as pl
from jax.experimental.pallas import tpu as pltpu


LANE = 128  # pad the 2 output logits to one full vreg lane row (unmasked vst)


def _sublane(dtype) -> int:
    # 8 sublanes for 32-bit dtypes, 16 for bf16/fp16, etc.
    return max(8, 32 // jnp.dtype(dtype).itemsize)


def _pick_tile(batch: int, tm_max: int, sub: int) -> int:
    """Batch-tile rows: multiple of `sub`, <= tm_max, >= 2 tiles for large B."""
    if batch <= sub:
        return batch  # full-dim block (allowed even when not a sublane multiple)
    target = min(tm_max, batch)
    if batch > 2 * LANE:
        # Split into at least 2 grid steps so megacore (v7x) can shard tiles.
        target = min(target, -(-batch // 2))
    return max(sub, (target // sub) * sub)


def _nsp_head_kernel(x_ref, w_ref, b_ref, o_ref):
    # x_ref: (tm, H)      activation tile
    # w_ref: (H, LANE)    pre-transposed, lane-padded weight (MXU-native)
    # b_ref: (1, LANE)    lane-padded bias (f32)
    # o_ref: (tm, LANE)
    acc = jnp.dot(x_ref[...], w_ref[...], preferred_element_type=jnp.float32)
    o_ref[...] = (acc + b_ref[...]).astype(o_ref.dtype)


def bert_only_nsp_head(pooled_output, weight, bias, *, tm=1024, use_pallas=None):
    """pooled_output: [B, H]; weight: [2, H] (PyTorch layout); bias: [2].

    Returns seq_relationship_score: [B, 2] in pooled_output.dtype.
    """
    B, H = pooled_output.shape
    N = weight.shape[0]  # = 2 for the NSP head
    assert weight.shape == (N, H) and bias.shape == (N,)
    assert N <= LANE
    out_dtype = pooled_output.dtype

    if use_pallas is None:
        use_pallas = B >= 16
    if not use_pallas:
        # Tiny-batch fast path: launch/step overhead dwarfs a 2-logit matvec.
        acc = jnp.dot(pooled_output, weight.astype(pooled_output.dtype).T,
                      preferred_element_type=jnp.float32)
        return (acc + bias.astype(jnp.float32)).astype(out_dtype)

    sub = _sublane(pooled_output.dtype)
    # Cap the tile so the double-buffered x tile stays ~8 MB (VMEM-safe on all
    # generations, including v7x's 64 MiB physical VMEM).
    bytes_per_row = H * jnp.dtype(pooled_output.dtype).itemsize
    tm_cap = max(sub, ((4 * 1024 * 1024) // bytes_per_row // sub) * sub)
    tm_eff = _pick_tile(B, min(tm, tm_cap), sub)
    grid = pl.cdiv(B, tm_eff)

    # One-time tiny relayout of the [2, H] weight: transpose + lane-pad so the
    # kernel matmul feeds the MXU directly and every store is lane-dense.
    w_t = jnp.zeros((H, LANE), pooled_output.dtype).at[:, :N].set(
        weight.astype(pooled_output.dtype).T)
    b_pad = jnp.zeros((1, LANE), jnp.float32).at[0, :N].set(
        bias.astype(jnp.float32))

    out = pl.pallas_call(
        _nsp_head_kernel,
        out_shape=jax.ShapeDtypeStruct((B, LANE), out_dtype),
        grid_spec=pltpu.PrefetchScalarGridSpec(
            num_scalar_prefetch=0,
            grid=(grid,),
            in_specs=[
                pl.BlockSpec((tm_eff, H), lambda i: (i, 0)),
                pl.BlockSpec((H, LANE), lambda i: (0, 0)),
                pl.BlockSpec((1, LANE), lambda i: (0, 0)),
            ],
            out_specs=pl.BlockSpec((tm_eff, LANE), lambda i: (i, 0)),
        ),
        compiler_params=pltpu.CompilerParams(
            dimension_semantics=("parallel",)),
    )(pooled_output, w_t, b_pad)

    # Partial tail blocks never write past row B; just drop the lane padding.
    return out[:, :N]


def _reference(pooled_output, weight, bias):
    return pooled_output @ weight.T + bias


if __name__ == "__main__":
    key = jax.random.PRNGKey(0)
    kx, kw, kb, kx2 = jax.random.split(key, 4)

    # Small shapes consistent with the module: batch=2, hidden=32.
    B, H = 2, 32
    pooled = jax.random.normal(kx, (B, H), dtype=jnp.float32)
    # nn.Linear(hidden_size, 2): weight [2, H], bias [2]  (PyTorch layout)
    weight = jax.random.normal(kw, (2, H), dtype=jnp.float32) * 0.02
    bias = jax.random.normal(kb, (2,), dtype=jnp.float32) * 0.02

    # Force the Pallas path even at this tiny batch so the kernel is exercised.
    scores = jax.block_until_ready(
        bert_only_nsp_head(pooled, weight, bias, use_pallas=True))
    ref = _reference(pooled, weight, bias)
    assert scores.shape == (B, 2), scores.shape
    assert jnp.allclose(scores, ref, atol=1e-5, rtol=1e-5), float(
        jnp.max(jnp.abs(scores - ref)))

    # Multi-tile path with a partial final block (batch not a tile multiple).
    B2 = 40
    pooled2 = jax.random.normal(kx2, (B2, H), dtype=jnp.float32)
    scores2 = jax.block_until_ready(
        bert_only_nsp_head(pooled2, weight, bias, tm=16, use_pallas=True))
    ref2 = _reference(pooled2, weight, bias)
    assert scores2.shape == (B2, 2), scores2.shape
    assert jnp.allclose(scores2, ref2, atol=1e-5, rtol=1e-5), float(
        jnp.max(jnp.abs(scores2 - ref2)))

    print("KERNEL_OK")
</pallas_src>

<mosaic_0001>
module attributes {stable_mosaic.version = 11 : i64} {
  func.func @_nsp_head_kernel(%arg0: i32, %arg1: memref<2x32xf32, #tpu.memory_space<vmem>>, %arg2: memref<32x128xf32, #tpu.memory_space<vmem>>, %arg3: memref<1x128xf32, #tpu.memory_space<vmem>>, %arg4: memref<2x128xf32, #tpu.memory_space<vmem>>) attributes {dimension_semantics = [#tpu.dimension_semantics<parallel>], iteration_bounds = array<i64: 1>, scalar_prefetch = 0 : i64, scratch_operands = 0 : i64, tpu.core_type = #tpu.core_type<tc>, window_params = [{transform_indices = @transform_0, window_bounds = array<i64: 2, 32>}, {pipeline_mode = #tpu.pipeline_mode<synchronous>, transform_indices = @transform_1, window_bounds = array<i64: 32, 128>}, {pipeline_mode = #tpu.pipeline_mode<synchronous>, transform_indices = @transform_2, window_bounds = array<i64: 1, 128>}, {transform_indices = @transform_3, window_bounds = array<i64: 2, 128>}]} {
    %c0 = arith.constant 0 : index
    %c0_0 = arith.constant 0 : index
    %0 = vector.load %arg1[%c0, %c0_0] : memref<2x32xf32, #tpu.memory_space<vmem>>, vector<2x32xf32>
    %c0_1 = arith.constant 0 : index
    %c0_2 = arith.constant 0 : index
    %1 = vector.load %arg2[%c0_1, %c0_2] : memref<32x128xf32, #tpu.memory_space<vmem>>, vector<32x128xf32>
    %cst = arith.constant dense<0.000000e+00> : vector<2x128xf32>
    %2 = tpu.matmul %0, %1, %cst {dimension_numbers = #tpu.dot_dimension_numbers<[1], [0], [0], [1], [0, 0, 1, 1], [], []>} : vector<2x32xf32>, vector<32x128xf32>, vector<2x128xf32> -> vector<2x128xf32>
    %c0_3 = arith.constant 0 : index
    %c0_4 = arith.constant 0 : index
    %3 = vector.load %arg3[%c0_3, %c0_4] : memref<1x128xf32, #tpu.memory_space<vmem>>, vector<1x128xf32>
    %4 = vector.broadcast %3 : vector<1x128xf32> to vector<2x128xf32>
    %5 = arith.addf %2, %4 : vector<2x128xf32>
    %c0_5 = arith.constant 0 : index
    %c0_6 = arith.constant 0 : index
    %6 = vector.load %arg4[%c0_5, %c0_6] : memref<2x128xf32, #tpu.memory_space<vmem>>, vector<2x128xf32>
    tpu.vector_store %arg4[%c0_5, %c0_6], %5 {strides = array<i32>} : memref<2x128xf32, #tpu.memory_space<vmem>>, vector<2x128xf32>,
    return
  }
  func.func @transform_0(%arg0: i32) -> (i32, i32) {
    %c0_i32 = arith.constant 0 : i32
    %c0_i32_0 = arith.constant 0 : i32
    return %arg0, %c0_i32 : i32, i32
  }
  func.func @transform_1(%arg0: i32) -> (i32, i32) {
    %c0_i32 = arith.constant 0 : i32
    %c0_i32_0 = arith.constant 0 : i32
    %c0_i32_1 = arith.constant 0 : i32
    return %c0_i32, %c0_i32_0 : i32, i32
  }
  func.func @transform_2(%arg0: i32) -> (i32, i32) {
    %c0_i32 = arith.constant 0 : i32
    %c0_i32_0 = arith.constant 0 : i32
    %c0_i32_1 = arith.constant 0 : i32
    return %c0_i32, %c0_i32_0 : i32, i32
  }
  func.func @transform_3(%arg0: i32) -> (i32, i32) {
    %c0_i32 = arith.constant 0 : i32
    %c0_i32_0 = arith.constant 0 : i32
    return %arg0, %c0_i32 : i32, i32
  }
}

</mosaic_0001>

<bundles_post_ra>
// kernel: tpu_custom_call.1
= control target key start
LH: loop header
LB: loop body
LE: loop exit
PB: predicated region body
PF: predicated region fallthrough
CT: control target
= control target key end

     0   :  { %8 = vsyncpa [#allocation3], 0  ;;  %s274_s0 = inlined_call_operand.hbm [shape: f32[2,32], index: 0, kind: input, shape index: {}]   ;;  %s275_s1 = inlined_call_operand.hbm [shape: f32[32,128], index: 1, kind: input, shape index: {}]   ;;  %s276_s2 = inlined_call_operand.vmem [shape: f32[1,128], index: 2, kind: input, shape index: {}]   ;;  %s277_s3 = inlined_call_operand.hbm [shape: f32[2,128], index: 3, kind: output, shape index: {}]  }
   0x1   :  { %9 = vsyncpa [#allocation6], 0 }
   0x2   :  { %10 = vsyncpa [#allocation4], 0  ;;  %s235_s12 = smov [#allocation2]   ;;  %s236_s14 = smov [#allocation5]  }
   0x3   :  { %s17_s13 = sshll.u32 %s235_s12, 4  ;;  %s26_s15 = sshll.u32 %s236_s14, 4  ;;  %s18_s13 = int_to_ptr.vmem [resolvable:$true] %s17_s13  ;;  %s27_s15 = int_to_ptr.vmem [resolvable:$true] %s26_s15 }
   0x4   :  { %s177_s16 = scalar_lea.vmem %s18_s13, 32  ;;  %p182_p1 = scmp.lt.s32.totalorder %s18_s13, %s18_s13 }
   0x5   :  { %p178_p0 = scmp.ne.s32.totalorder %s18_s13, %s177_s16  ;;  %p183_p2 = scmp.lt.s32.totalorder %s177_s16, %s177_s16 }
   0x7   :  { %p184_p3 = por %p183_p2, %p182_p1 }
   0x9   :  { %p185_p4 = pnand %p184_p3, %p178_p0 }
   0xb   :  { %188 = shalt.err (!%p185_p4)
}
   0xc   :  { %20 = dma.hbm_to_vmem [thread:$0]  %s274_s0, 32, %s18_s13, [#allocation3]  }
   0xd   :  { %s197_s19 = scalar_lea.vmem %s27_s15, 512  ;;  %p202_p6 = scmp.lt.s32.totalorder %s27_s15, %s27_s15 }
   0xe   :  { %p198_p5 = scmp.ne.s32.totalorder %s27_s15, %s197_s19  ;;  %p203_p7 = scmp.lt.s32.totalorder %s197_s19, %s197_s19 }
  0x10   :  { %p204_p8 = por %p203_p7, %p202_p6 }
  0x12   :  { %p205_p9 = pnand %p204_p8, %p198_p5 }
  0x14   :  { %208 = shalt.err (!%p205_p9)
}
  0x15   :  { %s237_s20 = smov 128   ;;  %s238_s21 = smov 8  }
  0x16   :  { %32 = dma.hbm_to_vmem [thread:$0]  %s275_s1, 512, %s27_s15, [#allocation6], %s237_s20, %s237_s20, %s238_s21  }
  0x17   :  { %229 = dma.done.wait [#allocation3], 32  }
  0x18   :  { %230 = vsyncadd [#allocation3], 4294967264 }
  0x19   :  { %231 = dma.done.wait [#allocation6], 512  }
  0x1a   :  { %232 = vsyncadd [#allocation6], 4294966784  ;;  %v239_v0 = vmov 0.0   ;;  %vm240_vm0 = vmmov 0   ;;  %v45_v1 = vld [vmem:[#allocation5 + $0x18] sm:$0xff]  ;;  %v44_v2 = vld [vmem:[#allocation5 + $0x10] sm:$0xff] }
  0x1b   :  { %151 = vmatprep.subr.mxu0 %v239_v0  ;;  %159 = vmatprep.mubr.msk.f32.mxu0 %vm240_vm0, %v239_v0  ;;  %v43_v3 = vld [vmem:[#allocation5 + $0x8] sm:$0xff]  ;;  %v42_v4 = vld [vmem:[#allocation5] sm:$0xff]  ;;  %v41_v5 = vld [vmem:[#allocation2] sm:$0x3]  ;;  %vm53_vm1 = vcmask 261120   ;;  %s241_s24 = smov [#allocation7]  }
  0x1c   :  { %152 = vmatpush3.msra.mxu0 %v45_v1  ;;  %v144_v6 = vld [vmem:[%s276_s2] ss:$0 sm:$0xff]  ;;  %s134_s25 = sshll.u32 %s241_s24, 4  ;;  %s135_s25 = int_to_ptr.vmem [resolvable:$true] %s134_s25 }
  0x1d   :  { %153 = vmatprep.subr.mxu0 %v239_v0  ;;  %s209_s26 = scalar_lea.vmem %s135_s25, 32  ;;  %p214_p11 = scmp.lt.s32.totalorder %s135_s25, %s135_s25 }
  0x1e   :  { %154 = vmatpush3.msra.mxu0 %v44_v2  ;;  %p210_p10 = scmp.ne.s32.totalorder %s135_s25, %s209_s26  ;;  %p215_p12 = scmp.lt.s32.totalorder %s209_s26, %s209_s26 }
  0x1f   :  { %155 = vmatprep.subr.mxu0 %v239_v0 }
  0x20   :  { %156 = vmatpush3.msra.mxu0 %v43_v3  ;;  %p216_p13 = por %p215_p12, %p214_p11 }
  0x21   :  { %157 = vmatprep.subr.mxu0 %v239_v0 }
  0x22   :  { %158 = vmatpush3.msra.mxu0 %v42_v4  ;;  %p217_p0 = pnand %p216_p13, %p210_p10 }
  0x23   :  { %160 = vmatmul.mubr.msk.f32.vlgmr.msra.gmra.mxu0 %vm53_vm1, %v41_v5 }
  0xe3   :  { %v123_v7 = vpop.f32.mrf.mxu0 }
  0xe4   :  { %v124_v8 = vadd.f32 %v144_v6, %v123_v7 }
  0xe5   :  { %v161_v9 = vpop.f32.mrf.mxu0 }
  0xe6   :  { %127 = vst [vmem:[#allocation7] sm:$0x3] %v124_v8 }
  0xe7   :  { %220 = shalt.err (!%p217_p0)
}
  0xe8   :  { %137 = dma.vmem_to_hbm [thread:$0]  %s135_s25, 32, %s277_s3, [#allocation4]  }
  0xe9   :  { %233 = dma.done.wait [#allocation4], 32  }
  0xea   :  { %234 = vsyncadd [#allocation4], 4294967264 }
  0xeb   :  { %141 = vsyncpa [#allocation3], 1 }
  0xec   :  { %142 = vsyncpa [#allocation6], 1 }
  0xed   :  { %143 = vsyncpa [#allocation4], 1 }

</bundles_post_ra>
